<compile_context>
chip_gen: v7x
topology: tpu7x:2x2x1
jax: 0.10.0
libtpu: 0.0.40
codegen_flags: <defaults>
</compile_context>

<pallas_src>
import functools

import jax
import jax.numpy as jnp
from jax.experimental import pallas as pl
from jax.experimental.pallas import tpu as pltpu


def quant_mlp_kernel(x_ref, gu_q_ref, gu_s_ref, dq_ref, ds_ref, o_ref, *, ti):
    j = pl.program_id(1)

    # The output tile is resident across the intermediate (reduction) axis
    # because its index_map ignores j, so it doubles as the f32 accumulator.
    @pl.when(j == 0)
    def _():
        o_ref[...] = jnp.zeros_like(o_ref)

    # bf16 MXU operands, f32 accumulation; per-channel scales applied to the
    # small output tiles (int8 weights are never dequantized to f32 in VMEM).
    x = x_ref[...]                                                 # bf16 [TM, H]
    gu_w = gu_q_ref[...].astype(jnp.bfloat16)                      # [H, 2*TI]
    gu = jnp.dot(x, gu_w, preferred_element_type=jnp.float32)      # [TM, 2*TI]
    gu = gu * gu_s_ref[...]                                        # f32 scales

    g = gu[:, :ti]                                                 # gate block j
    u = gu[:, ti:]                                                 # up   block j
    h = (g * jax.nn.sigmoid(g)) * u                                # SiLU(g)*u, f32

    dw = dq_ref[...].astype(jnp.bfloat16)                          # [TI, H]
    o_ref[...] += jnp.dot(h.astype(jnp.bfloat16), dw,
                          preferred_element_type=jnp.float32)

    @pl.when(j == pl.num_programs(1) - 1)
    def _():
        # Down-proj per-output-channel scale applied once to the finished
        # f32 accumulator, in place.
        o_ref[...] = o_ref[...] * ds_ref[...]


def quantize_int8(w):
    """Symmetric per-output-channel int8 quantization (absmax/127).

    w: [out_features, in_features] float32 (PyTorch Linear convention).
    Returns (wq_t [in, out] int8, scale [1, out] float32).
    """
    absmax = jnp.max(jnp.abs(w), axis=1, keepdims=True)            # [out, 1]
    scale = jnp.where(absmax > 0, absmax / 127.0, 1.0)
    wq = jnp.clip(jnp.round(w / scale), -127, 127).astype(jnp.int8)
    return wq.T, scale.T                                           # [in,out], [1,out]


def pack_quant_mlp_params(w_gate, w_up, w_down, *, ti=512):
    """One-time weight quantization + gate/up interleave (call at load time).

    Interleaves gate/up column blocks at TI granularity so grid step j loads a
    single [H, 2*TI] tile = [gate block j | up block j] (one DMA, one fused
    gate+up MXU matmul).
    """
    gq, gs = quantize_int8(w_gate)    # [H, I] int8, [1, I] f32
    uq, us = quantize_int8(w_up)      # [H, I] int8, [1, I] f32
    dq, ds = quantize_int8(w_down)    # [I, H] int8, [1, H] f32
    hidden, inter = gq.shape
    assert ti % 64 == 0, "ti must keep 2*ti lane-aligned (multiple of 128)"
    assert inter % ti == 0, "intermediate_size must be a multiple of ti"
    n_int = inter // ti

    gu_q = jnp.stack(
        [gq.reshape(hidden, n_int, ti), uq.reshape(hidden, n_int, ti)],
        axis=2).reshape(hidden, 2 * inter)
    gu_s = jnp.stack(
        [gs.reshape(1, n_int, ti), us.reshape(1, n_int, ti)],
        axis=2).reshape(1, 2 * inter)

    return {"gu_q": gu_q, "gu_s": gu_s, "dq": dq, "ds": ds,
            "ti": ti, "hidden": hidden, "inter": inter}


def _round_up(x, m):
    return ((x + m - 1) // m) * m


def _chip_defaults():
    """Per-generation (token-tile target, VMEM capacity bytes)."""
    cap = None
    try:
        cap = int(pltpu.get_tpu_info().vmem_capacity_bytes)
    except Exception:
        cap = None
    kind = ""
    try:
        kind = jax.devices()[0].device_kind.lower()
    except Exception:
        pass
    if "v7" in kind or (cap is not None and cap <= 96 * 1024 * 1024):
        # v7x: 64 MiB VMEM, ridge ~620 FLOP/B -> TM=384 clears it and fits.
        return 384, (cap or 64 * 1024 * 1024)
    if "v6" in kind:
        # v6e: TM=256 is weight-DMA bound (~512 FLOP/B vs ~650 ridge); TM=512
        # doubles weight reuse and is MXU-bound.  128 MiB VMEM holds it.
        return 512, (cap or 128 * 1024 * 1024)
    if "v5" in kind:
        # v5e: ridge ~240 FLOP/B, already MXU-bound at TM=256.
        return 256, (cap or 128 * 1024 * 1024)
    return 256, (cap or 64 * 1024 * 1024)


def quant_deepseek_mlp(x, packed, *, tm=None):
    """x: [batch, seq, hidden] float -> [batch, seq, hidden] (same dtype)."""
    b, s, hidden = x.shape
    assert hidden == packed["hidden"]
    ti = packed["ti"]
    inter = packed["inter"]
    n_int = inter // ti
    tokens = b * s

    # bf16 activations: halves the x tile's VMEM and HBM DMA, and removes the
    # per-step in-kernel cast (the tile is resident across the j loop).
    x2 = x.reshape(tokens, hidden).astype(jnp.bfloat16)

    tm_target, vmem_cap = _chip_defaults()
    if tm is None:
        tm = tm_target
    tm = max(16, (tm // 16) * 16)                       # bf16 (16,128) tile
    # Pad the token axis to a multiple of TM instead of requiring
    # divisibility; padded rows are zeros and are sliced off afterwards.
    padded = _round_up(max(tokens, 16), 16)
    tm = min(tm, padded)
    padded = _round_up(tokens, tm)
    if padded != tokens:
        x2 = jnp.pad(x2, ((0, padded - tokens), (0, 0)))
    n_tok = padded // tm
    # TODO(synk): for decode-sized inputs (n_tok == 1) on v7x megacore, split
    # the intermediate reduction across the two TensorCores instead.

    # Per-step VMEM budget (double-buffered inputs/outputs; the f32 output
    # tile is the accumulator), clamped to the physical chip capacity.
    est = (2 * tm * hidden * 2          # x (bf16, double-buffered)
           + 2 * hidden * 2 * ti * 1    # fused gate/up int8 tile
           + 2 * 2 * ti * 4             # gate/up scales
           + 2 * ti * hidden * 1        # down int8 tile
           + 2 * hidden * 4             # down scale
           + 2 * tm * hidden * 4)       # output/accumulator tile (f32)
    vmem_limit = min(vmem_cap,
                     max(32 * 1024 * 1024, int(est * 1.25) + (4 << 20)))

    grid_spec = pltpu.PrefetchScalarGridSpec(
        num_scalar_prefetch=0,
        grid=(n_tok, n_int),
        in_specs=[
            pl.BlockSpec((tm, hidden), lambda i, j: (i, 0)),      # x (resident over j)
            pl.BlockSpec((hidden, 2 * ti), lambda i, j: (0, j)),  # fused gate/up int8
            pl.BlockSpec((1, 2 * ti), lambda i, j: (0, j)),       # fused gate/up scale
            pl.BlockSpec((ti, hidden), lambda i, j: (j, 0)),      # down int8 rows
            pl.BlockSpec((1, hidden), lambda i, j: (0, 0)),       # down scale
        ],
        out_specs=pl.BlockSpec((tm, hidden), lambda i, j: (i, 0)),
    )

    out2 = pl.pallas_call(
        functools.partial(quant_mlp_kernel, ti=ti),
        out_shape=jax.ShapeDtypeStruct((padded, hidden), jnp.float32),
        grid_spec=grid_spec,
        compiler_params=pltpu.CompilerParams(
            dimension_semantics=("parallel", "arbitrary"),
            vmem_limit_bytes=vmem_limit),
    )(x2, packed["gu_q"], packed["gu_s"], packed["dq"], packed["ds"])

    return out2[:tokens].reshape(b, s, hidden).astype(x.dtype)


def reference_mlp_bf16(x2, params):
    """Plain-JAX reference that mirrors the kernel's bf16-matmul / f32-scale math."""
    gq, gs = params["gate"]
    uq, us = params["up"]
    dq, ds = params["down"]
    xb = x2.astype(jnp.bfloat16)
    g = jnp.dot(xb, gq.astype(jnp.bfloat16), preferred_element_type=jnp.float32) * gs
    u = jnp.dot(xb, uq.astype(jnp.bfloat16), preferred_element_type=jnp.float32) * us
    h = (g * jax.nn.sigmoid(g)) * u
    return jnp.dot(h.astype(jnp.bfloat16), dq.astype(jnp.bfloat16),
                   preferred_element_type=jnp.float32) * ds


def reference_mlp_f32(x2, params):
    """Full-f32 dequantized reference (module semantics)."""
    gq, gs = params["gate"]
    uq, us = params["up"]
    dq, ds = params["down"]
    wg = gq.astype(jnp.float32) * gs
    wu = uq.astype(jnp.float32) * us
    wd = dq.astype(jnp.float32) * ds
    g = x2 @ wg
    u = x2 @ wu
    h = (g * jax.nn.sigmoid(g)) * u
    return h @ wd


if __name__ == "__main__":
    # Small shapes consistent with the module's forward (lane-friendly dims so
    # the grid is non-trivial: grid = (2 token tiles, 4 intermediate tiles)).
    batch, seq, hidden, intermediate = 2, 16, 128, 256

    key = jax.random.PRNGKey(0)
    kx, kg, ku, kd = jax.random.split(key, 4)

    x = jax.random.normal(kx, (batch, seq, hidden), dtype=jnp.float32)

    # nn.Linear weight shapes: [out_features, in_features], no bias.
    w_gate = jax.random.normal(kg, (intermediate, hidden), dtype=jnp.float32) * 0.05
    w_up   = jax.random.normal(ku, (intermediate, hidden), dtype=jnp.float32) * 0.05
    w_down = jax.random.normal(kd, (hidden, intermediate), dtype=jnp.float32) * 0.05

    # One-time weight quantization + packing (hoisted out of the forward path).
    packed = pack_quant_mlp_params(w_gate, w_up, w_down, ti=64)

    out = quant_deepseek_mlp(x, packed, tm=16)
    out = jax.block_until_ready(out)

    params = {
        "gate": quantize_int8(w_gate),
        "up":   quantize_int8(w_up),
        "down": quantize_int8(w_down),
    }
    x2 = x.reshape(-1, hidden)
    ref_b = reference_mlp_bf16(x2, params).reshape(batch, seq, hidden)
    ref_f = reference_mlp_f32(x2, params).reshape(batch, seq, hidden)

    assert jnp.allclose(out, ref_b, atol=2e-3, rtol=2e-3), \
        "mismatch vs bf16-matmul reference"
    assert jnp.allclose(out, ref_f, atol=5e-2, rtol=5e-2), \
        "mismatch vs f32 dequant reference"

    print("KERNEL_OK")
</pallas_src>

<mosaic_0001>
module attributes {stable_mosaic.version = 11 : i64} {
  func.func @quant_mlp_kernel(%arg0: i32, %arg1: i32, %arg2: memref<16x128xbf16, #tpu.memory_space<vmem>>, %arg3: memref<128x128xi8, #tpu.memory_space<vmem>>, %arg4: memref<1x128xf32, #tpu.memory_space<vmem>>, %arg5: memref<64x128xi8, #tpu.memory_space<vmem>>, %arg6: memref<1x128xf32, #tpu.memory_space<vmem>>, %arg7: memref<16x128xf32, #tpu.memory_space<vmem>>) attributes {dimension_semantics = [#tpu.dimension_semantics<parallel>, #tpu.dimension_semantics<arbitrary>], iteration_bounds = array<i64: 2, 4>, scalar_prefetch = 0 : i64, scratch_operands = 0 : i64, tpu.core_type = #tpu.core_type<tc>, window_params = [{transform_indices = @transform_0, window_bounds = array<i64: 16, 128>}, {transform_indices = @transform_1, window_bounds = array<i64: 128, 128>}, {transform_indices = @transform_2, window_bounds = array<i64: 1, 128>}, {transform_indices = @transform_3, window_bounds = array<i64: 64, 128>}, {pipeline_mode = #tpu.pipeline_mode<synchronous>, transform_indices = @transform_4, window_bounds = array<i64: 1, 128>}, {transform_indices = @transform_5, window_bounds = array<i64: 16, 128>}]} {
    %c0_i32 = arith.constant 0 : i32
    %0 = arith.cmpi eq, %arg1, %c0_i32 : i32
    %1 = arith.extui %0 : i1 to i32
    %c0_i32_0 = arith.constant 0 : i32
    %2 = arith.cmpi ne, %1, %c0_i32_0 : i32
    scf.if %2 {
      %cst_15 = arith.constant 0.000000e+00 : f32
      %29 = vector.broadcast %cst_15 : f32 to vector<16x128xf32>
      %c0_16 = arith.constant 0 : index
      %c0_17 = arith.constant 0 : index
      %30 = vector.load %arg7[%c0_16, %c0_17] : memref<16x128xf32, #tpu.memory_space<vmem>>, vector<16x128xf32>
      tpu.vector_store %arg7[%c0_16, %c0_17], %29 {strides = array<i32>} : memref<16x128xf32, #tpu.memory_space<vmem>>, vector<16x128xf32>,
    } else {
    }
    %c0 = arith.constant 0 : index
    %c0_1 = arith.constant 0 : index
    %3 = vector.load %arg2[%c0, %c0_1] : memref<16x128xbf16, #tpu.memory_space<vmem>>, vector<16x128xbf16>
    %c0_2 = arith.constant 0 : index
    %c0_3 = arith.constant 0 : index
    %4 = vector.load %arg3[%c0_2, %c0_3] : memref<128x128xi8, #tpu.memory_space<vmem>>, vector<128x128xi8>
    %5 = arith.sitofp %4 : vector<128x128xi8> to vector<128x128xbf16>
    %cst = arith.constant dense<0.000000e+00> : vector<16x128xf32>
    %6 = tpu.matmul %3, %5, %cst {dimension_numbers = #tpu.dot_dimension_numbers<[1], [0], [0], [1], [0, 0, 1, 1], [], []>} : vector<16x128xbf16>, vector<128x128xbf16>, vector<16x128xf32> -> vector<16x128xf32>
    %c0_4 = arith.constant 0 : index
    %c0_5 = arith.constant 0 : index
    %7 = vector.load %arg4[%c0_4, %c0_5] : memref<1x128xf32, #tpu.memory_space<vmem>>, vector<1x128xf32>
    %8 = vector.broadcast %7 : vector<1x128xf32> to vector<16x128xf32>
    %9 = arith.mulf %6, %8 : vector<16x128xf32>
    %10 = vector.extract_strided_slice %9 {offsets = [0, 0], sizes = [16, 64], strides = [1, 1]} : vector<16x128xf32> to vector<16x64xf32>
    %11 = vector.extract_strided_slice %9 {offsets = [0, 64], sizes = [16, 64], strides = [1, 1]} : vector<16x128xf32> to vector<16x64xf32>
    %12 = arith.negf %10 : vector<16x64xf32>
    %13 = math.exp %12 : vector<16x64xf32>
    %cst_6 = arith.constant 1.000000e+00 : f32
    %14 = vector.broadcast %cst_6 : f32 to vector<16x64xf32>
    %15 = arith.addf %14, %13 : vector<16x64xf32>
    %16 = arith.divf %14, %15 : vector<16x64xf32>
    %17 = arith.mulf %10, %16 : vector<16x64xf32>
    %18 = arith.mulf %17, %11 : vector<16x64xf32>
    %c0_7 = arith.constant 0 : index
    %c0_8 = arith.constant 0 : index
    %19 = vector.load %arg5[%c0_7, %c0_8] : memref<64x128xi8, #tpu.memory_space<vmem>>, vector<64x128xi8>
    %20 = arith.sitofp %19 : vector<64x128xi8> to vector<64x128xbf16>
    %c0_9 = arith.constant 0 : index
    %c0_10 = arith.constant 0 : index
    %21 = vector.load %arg7[%c0_9, %c0_10] : memref<16x128xf32, #tpu.memory_space<vmem>>, vector<16x128xf32>
    %22 = arith.truncf %18 : vector<16x64xf32> to vector<16x64xbf16>
    %cst_11 = arith.constant dense<0.000000e+00> : vector<16x128xf32>
    %23 = tpu.matmul %22, %20, %cst_11 {dimension_numbers = #tpu.dot_dimension_numbers<[1], [0], [0], [1], [0, 0, 1, 1], [], []>} : vector<16x64xbf16>, vector<64x128xbf16>, vector<16x128xf32> -> vector<16x128xf32>
    %24 = arith.addf %21, %23 : vector<16x128xf32>
    %c0_12 = arith.constant 0 : index
    %c0_13 = arith.constant 0 : index
    %25 = vector.load %arg7[%c0_12, %c0_13] : memref<16x128xf32, #tpu.memory_space<vmem>>, vector<16x128xf32>
    tpu.vector_store %arg7[%c0_12, %c0_13], %24 {strides = array<i32>} : memref<16x128xf32, #tpu.memory_space<vmem>>, vector<16x128xf32>,
    %c3_i32 = arith.constant 3 : i32
    %26 = arith.cmpi eq, %arg1, %c3_i32 : i32
    %27 = arith.extui %26 : i1 to i32
    %c0_i32_14 = arith.constant 0 : i32
    %28 = arith.cmpi ne, %27, %c0_i32_14 : i32
    scf.if %28 {
      %c0_15 = arith.constant 0 : index
      %c0_16 = arith.constant 0 : index
      %29 = vector.load %arg7[%c0_15, %c0_16] : memref<16x128xf32, #tpu.memory_space<vmem>>, vector<16x128xf32>
      %c0_17 = arith.constant 0 : index
      %c0_18 = arith.constant 0 : index
      %30 = vector.load %arg6[%c0_17, %c0_18] : memref<1x128xf32, #tpu.memory_space<vmem>>, vector<1x128xf32>
      %31 = vector.broadcast %30 : vector<1x128xf32> to vector<16x128xf32>
      %32 = arith.mulf %29, %31 : vector<16x128xf32>
      %c0_19 = arith.constant 0 : index
      %c0_20 = arith.constant 0 : index
      %33 = vector.load %arg7[%c0_19, %c0_20] : memref<16x128xf32, #tpu.memory_space<vmem>>, vector<16x128xf32>
      tpu.vector_store %arg7[%c0_19, %c0_20], %32 {strides = array<i32>} : memref<16x128xf32, #tpu.memory_space<vmem>>, vector<16x128xf32>,
    } else {
    }
    return
  }
  func.func @transform_0(%arg0: i32, %arg1: i32) -> (i32, i32) {
    %c0_i32 = arith.constant 0 : i32
    %c0_i32_0 = arith.constant 0 : i32
    return %arg0, %c0_i32 : i32, i32
  }
  func.func @transform_1(%arg0: i32, %arg1: i32) -> (i32, i32) {
    %c0_i32 = arith.constant 0 : i32
    %c0_i32_0 = arith.constant 0 : i32
    return %c0_i32, %arg1 : i32, i32
  }
  func.func @transform_2(%arg0: i32, %arg1: i32) -> (i32, i32) {
    %c0_i32 = arith.constant 0 : i32
    %c0_i32_0 = arith.constant 0 : i32
    return %c0_i32, %arg1 : i32, i32
  }
  func.func @transform_3(%arg0: i32, %arg1: i32) -> (i32, i32) {
    %c0_i32 = arith.constant 0 : i32
    %c0_i32_0 = arith.constant 0 : i32
    return %arg1, %c0_i32 : i32, i32
  }
  func.func @transform_4(%arg0: i32, %arg1: i32) -> (i32, i32) {
    %c0_i32 = arith.constant 0 : i32
    %c0_i32_0 = arith.constant 0 : i32
    %c0_i32_1 = arith.constant 0 : i32
    return %c0_i32, %c0_i32_0 : i32, i32
  }
  func.func @transform_5(%arg0: i32, %arg1: i32) -> (i32, i32) {
    %c0_i32 = arith.constant 0 : i32
    %c0_i32_0 = arith.constant 0 : i32
    return %arg0, %c0_i32 : i32, i32
  }
}

</mosaic_0001>

<bundles_post_ra>
// kernel: tpu_custom_call.1
= control target key start
LH: loop header
LB: loop body
LE: loop exit
PB: predicated region body
PF: predicated region fallthrough
CT: control target
= control target key end

     0   :  { %s1554_s0 = inlined_call_operand.hbm [shape: bf16[32,128], index: 0, kind: input, shape index: {}]   ;;  %s1555_s1 = inlined_call_operand.hbm [shape: s8[128,512], index: 1, kind: input, shape index: {}]   ;;  %s1556_s2 = inlined_call_operand.vmem [shape: f32[1,512], index: 2, kind: input, shape index: {}]   ;;  %s1557_s3 = inlined_call_operand.hbm [shape: s8[256,128], index: 3, kind: input, shape index: {}]   ;;  %s1558_s4 = inlined_call_operand.vmem [shape: f32[1,128], index: 4, kind: input, shape index: {}]   ;;  %s1559_s5 = inlined_call_operand.hbm [shape: f32[32,128], index: 5, kind: output, shape index: {}]  }
   0x1   :  { %1574 = sst [smem:[#allocation19_spill]] %s1554_s0 }
   0x2   :  { %1575 = sst [smem:[#allocation20_spill]] %s1555_s1 }
   0x3   :  { %1576 = sst [smem:[#allocation21_spill]] %s1558_s4 }
   0x4   :  { %1577 = sst [smem:[#allocation22_spill]] %s1559_s5 }
   0x5   :  { %10 = vsyncpa [#allocation3], 0 }
   0x6   :  { %12 = vsyncpa [#allocation3 + $0x1], 0 }
   0x7   :  { %13 = vsyncpa [#allocation6], 0 }
   0x8   :  { %15 = vsyncpa [#allocation6 + $0x1], 0 }
   0x9   :  { %16 = vsyncpa [#allocation4], 0 }
   0xa   :  { %18 = vsyncpa [#allocation4 + $0x1], 0  ;;  %s1148_s18 = smov 0   ;;  %s1150_s19 = smov 0  }
   0xb   :  { %s1152_s20 = smov 0   ;;  %s1154_s21 = smov 0  }
   0xc   :  { %s1156_s22 = smov 0   ;;  %s1158_s23 = smov 0  }
   0xd   :  { %s1160_s24 = smov 0   ;;  %s1162_s25 = smov 0  }
   0xe   :  { %s1164_s26 = smov 0   ;;  %s1166_s27 = smov 0  }
   0xf   :  { %s1168_s28 = smov 0  }
  0x10 LB: > { %1578 = sst [smem:[#allocation12_spill]] %s1081_s23  ;;  %s33_s29 = sadd.s32 1, %s1093_s26  ;;  %s1101_s28 = sphi %s1168_s28, %s24_s28   ;;  %s1097_s27 = sphi %s1166_s27, %s1626_s27   ;;  %s1093_s26 = sphi %s1164_s26, %s1625_s26   ;;  %s1089_s25 = sphi %s1162_s25, %s1616_s25   ;;  %s1085_s24 = sphi %s1160_s24, %s1624_s24   ;;  %s1081_s23 = sphi %s1158_s23, %s1615_s23   ;;  %s1077_s22 = sphi %s1156_s22, %s1623_s22   ;;  %s1073_s21 = sphi %s1154_s21, %s1622_s21   ;;  %s1069_s20 = sphi %s1152_s20, %s1621_s20   ;;  %s1065_s19 = sphi %s1150_s19, %s1620_s19   ;;  %s1061_s18 = sphi %s1148_s18, %s1619_s18  }
  0x11   : > { %1579 = sst [smem:[#allocation13_spill]] %s1089_s25  ;;  %p1562_p0 = scmp.eq.s32.totalorder %s1101_s28, 0 }
  0x12   : > { %1580 = sst [smem:[#allocation14_spill]] %s1097_s27  ;;  %p1205_p1 = scmp.ge.s32.totalorder %s33_s29, 4 }
  0x13   : > { %s69_s6 = sadd.s32 1, %s1069_s20  ;;  %p76_p2 = scmp.ne.s32.totalorder %s1069_s20, %s1065_s19 }
  0x14   : > { %s1628_s29 = smov (%p1205_p1, %s33_s29), 0  ;;  %p1561_p5 = scmp.lt.s32.totalorder %s1101_s28, 8 }
  0x15   : > { %1582 = sst [smem:[#allocation15_spill]] %s1628_s29  ;;  %p78_p4 = por %p76_p2, %p1562_p0 }
  0x16   : > { %s66_s7 = ssub.s32 %s1093_s26, %s1628_s29  ;;  %s229_s8 = sand.u32 1, %s1101_s28  }
  0x17   : > { %p67_p6 = scmp.eq.s32.totalorder %s66_s7, 0  ;;  %s1560_s9 = sand.u32 1, %s1069_s20  }
  0x18   : > { %s681_s11 = sshll.u32 %s1560_s9, 5  ;;  %s682_s12 = sshll.u32 %s1093_s26, 7 }
  0x19   : > { %s1226_s10 = scalar_select %p67_p6, %s1069_s20, %s69_s6  }
  0x1a   : > { %s1584_s1 = sld [smem:[#allocation20_spill]]  ;;  %s233_s16 = scalar_lea.vmem [#allocation5], %s681_s11 }
  0x1b   : > { %1583 = sst [smem:[#allocation16_spill]] %s1226_s10  ;;  %s239_s17 = sshll.u32 %s233_s16, 4  ;;  %s1242_s17 = int_to_ptr.vmem [resolvable:$true] %s239_s17 }
  0x1c   : > { %p1238_p7 = pnand %p1561_p5, %p78_p4  ;;  %s1245_s6 = scalar_lea.sflag [#allocation6], %s229_s8 }
  0x1e   : > { %p1566_p10 = pneg %p1238_p7 }
  0x20   : > { %s1234_s15 = scalar_lea.hbm %s1584_s1, %s682_s12  ;;  %s890_s14 = scalar_lea.hbm %s1584_s1, 2048 }
  0x21   : > { %s885_s12 = scalar_lea.hbm %s1234_s15, 512  ;;  %p891_p13 = scmp.lt.u32.totalorder %s1234_s15, %s1584_s1 }
  0x22   : > { %p886_p9 = scmp.ne.s32.totalorder %s1234_s15, %s885_s12  ;;  %p892_p2 = scmp.lt.u32.totalorder %s890_s14, %s885_s12 }
  0x23   : > { %p894_p6 = scmp.lt.u32.totalorder %s885_s12, %s1234_s15 }
  0x24   : > { %p888_p11 = pnand %p1566_p10, %p886_p9  ;;  %p893_p4 = por %p892_p2, %p891_p13 }
  0x26   : > { %p889_p12 = pneg %p888_p11  ;;  %p895_p5 = por %p894_p6, %p893_p4 }
  0x28   : > { %p896_p3 = pnand %p895_p5, %p889_p12 }
  0x2a   : > { %899 = shalt.err (!%p896_p3)
}
  0x2b   : > { %s900_s8 = scalar_lea.vmem %s1242_s17, 512  ;;  %s1103_s11 = smov [#allocation5]  }
  0x2c   : > { %p901_p9 = scmp.ne.s32.totalorder %s1242_s17, %s900_s8  ;;  %s905_s13 = sshll.u32 %s1103_s11, 4  ;;  %s906_s13 = int_to_ptr.vmem [resolvable:$false] %s905_s13 }
  0x2d   : > { %s907_s9 = scalar_lea.vmem %s906_s13, 1024  ;;  %p908_p8 = scmp.lt.s32.totalorder %s1242_s17, %s906_s13 }
  0x2e   : > { %p903_p11 = pnand %p901_p9, %p1566_p10  ;;  %p909_p13 = scmp.lt.s32.totalorder %s907_s9, %s900_s8 }
  0x30   : > { %p904_p0 = pneg %p903_p11  ;;  %p910_p2 = por %p909_p13, %p908_p8 }
  0x32   : > { %p911_p4 = pnand %p910_p2, %p904_p0 }
  0x34   : > { %914 = shalt.err (!%p911_p4)
}
  0x35   : > { %s1104_s12 = smov 512   ;;  %s1563_s14 = smov 128  }
  0x36   : > { %s1564_s16 = smov 8   ;;  %p274_p0 = scmp.lt.s32.totalorder %s1101_s28, 9 }
  0x37   : > { %767 = dma.hbm_to_vmem [thread:$0]  (!%p1238_p7), %s1234_s15, 512, %s1242_s17, %s1245_s6, %s1104_s12, %s1563_s14, %s1564_s16  }
  0x38   : > { %p1586_p3 = scmp.ge.s32.totalorder %s1101_s28, 1  ;;  %s1283_s11 = sadd.s32 4294967295, %s1101_s28  }
  0x39   : > { %s675_s13 = sadd.s32 4294967294, %s1101_s28   ;;  %s36_s9 = sadd.s32 1, %s1097_s27 }
  0x3a   : > { %p1278_p5 = pnand %p1586_p3, %p274_p0  ;;  %s43_s1 = sadd.s32 1, %s1081_s23 }
  0x3b   : > { %s1630_s9 = smov (!%p1205_p1, %s36_s9), %s1097_s27  ;;  %p50_p8 = scmp.ne.s32.totalorder %s1081_s23, %s1077_s22 }
  0x3c   : > { %s1587_s8 = scalar_select %p1278_p5, 1, 0 }
  0x3d   : > { %p56_p12 = scmp.ne.s32.totalorder %s1077_s22, %s1073_s21  ;;  %p38_p6 = scmp.ge.s32.totalorder %s1630_s9, 2 }
  0x3e   : > { %p57_p9 = scmp.eq.s32.totalorder %s1283_s11, 0  ;;  %p1588_p11 = scmp.eq.s32.totalorder %s1101_s28, 0 }
  0x3f   : > { %p179_p2 = scmp.eq.s32.totalorder %s1283_s11, 7  ;;  %s1632_s9 = smov (%p38_p6, %s1630_s9), 0 }
  0x40   : > { %p1298_p13 = por %p1588_p11, %p50_p8  ;;  %1590 = sst [smem:[#allocation17_spill]] %s1632_s9 }
  0x41   : > { %p1308_p1 = por %p57_p9, %p56_p12  ;;  %p1592_p4 = scmp.ne.s32.totalorder %s1065_s19, %s1061_s18 }
  0x42   : > { %s40_s12 = ssub.s32 %s1097_s27, %s1632_s9  ;;  %p1321_p3 = por %p179_p2, %p50_p8 }
  0x43   : > { %s1591_s30 = scalar_select %p1308_p1, 1, 0 }
  0x44   : > { %p1315_p0 = por %p1592_p4, %p57_p9  ;;  %p41_p11 = scmp.eq.s32.totalorder %s40_s12, 0 }
  0x45   : > { %s1594_s14 = scalar_select %p1321_p3, 1, 0 }
  0x46   : > { %s1593_s17 = scalar_select %p1315_p0, 1, 0 }
  0x47   : > { %p185_p6 = scmp.eq.s32.totalorder %s675_s13, 7  ;;  %s208_s16 = sand.u32 1, %s1081_s23  }
  0x48   : > { %s704_s29 = sshll.u32 %s1097_s27, 7  ;;  %s678_s18 = sshll.u32 %s208_s16, 3 }
  0x49   : > { %s1328_s10 = scalar_select %p41_p11, %s1081_s23, %s43_s1  }
  0x4a   : > { %p1333_p10 = por %p185_p6, %p56_p12  ;;  %s1597_s0 = sld [smem:[#allocation19_spill]] }
  0x4b   : > { %1595 = sst [smem:[#allocation18_spill]] %s1328_s10  ;;  %p1598_p8 = scmp.lt.s32.totalorder %s1101_s28, 8 }
  0x4c   : > { %s1596_s5 = scalar_select %p1333_p10, 1, 0 }
  0x4d   : > { %p1346_p9 = pnand %p1598_p8, %p1298_p13  ;;  %s212_s13 = scalar_lea.vmem [#allocation2], %s678_s18 }
  0x4e   : > { %s219_s12 = sshll.u32 %s212_s13, 4  ;;  %s1600_s27 = sand.u32 1, %s1069_s20   ;;  %s1350_s12 = int_to_ptr.vmem [resolvable:$true] %s219_s12 }
  0x4f   : > { %s1354_s4 = sshll.u32 %s1600_s27, 4  ;;  %s1356_s25 = scalar_lea.sflag [#allocation3], %s208_s16 }
  0x50   : > { %s1340_s9 = scalar_lea.hbm %s1597_s0, %s704_s29  ;;  %p917_p2 = pneg %p1346_p9 }
  0x51   : > { %s915_s29 = scalar_lea.hbm %s1340_s9, 128  ;;  %s920_s18 = scalar_lea.hbm %s1597_s0, 256 }
  0x52   : > { %p916_p12 = scmp.ne.s32.totalorder %s1340_s9, %s915_s29  ;;  %p921_p11 = scmp.lt.u32.totalorder %s1340_s9, %s1597_s0 }
  0x53   : > { %p922_p6 = scmp.lt.u32.totalorder %s920_s18, %s915_s29  ;;  %p924_p10 = scmp.lt.u32.totalorder %s915_s29, %s1340_s9 }
  0x54   : > { %p918_p13 = pnand %p917_p2, %p916_p12 }
  0x55   : > { %p923_p8 = por %p922_p6, %p921_p11 }
  0x56   : > { %p919_p4 = pneg %p918_p13 }
  0x57   : > { %p925_p3 = por %p924_p10, %p923_p8 }
  0x59   : > { %p926_p0 = pnand %p925_p3, %p919_p4 }
  0x5b   : > { %929 = shalt.err (!%p926_p0)
}
  0x5c   : > { %s930_s27 = scalar_lea.vmem %s1350_s12, 128  ;;  %s1107_s10 = smov [#allocation2]  }
  0x5d   : > { %p931_p12 = scmp.ne.s32.totalorder %s1350_s12, %s930_s27  ;;  %s935_s16 = sshll.u32 %s1107_s10, 4  ;;  %s936_s16 = int_to_ptr.vmem [resolvable:$false] %s935_s16 }
  0x5e   : > { %s937_s23 = scalar_lea.vmem %s936_s16, 256  ;;  %p938_p5 = scmp.lt.s32.totalorder %s1350_s12, %s936_s16 }
  0x5f   : > { %p933_p13 = pnand %p931_p12, %p917_p2  ;;  %p939_p11 = scmp.lt.s32.totalorder %s937_s23, %s930_s27 }
  0x61   : > { %p934_p1 = pneg %p933_p13  ;;  %p940_p6 = por %p939_p11, %p938_p5 }
  0x63   : > { %p941_p10 = pnand %p940_p6, %p934_p1 }
  0x65   : > { %944 = shalt.err (!%p941_p10)
}
  0x66   : > { %s1108_s29 = smov 64   ;;  %s1109_s15 = smov 4  }
  0x67   : > { %764 = dma.hbm_to_vmem [thread:$0]  (!%p1346_p9), %s1340_s9, 128, %s1350_s12, %s1356_s25, %s1108_s29, %s1108_s29, %s1109_s15  }
  0x68   : > { %s705_s18 = sshll.u32 %s1093_s26, 8  ;;  %s259_s27 = scalar_lea.vmem [#allocation7], %s1354_s4 }
  0x69   : > { %s1388_s16 = scalar_lea.hbm %s1557_s3, %s705_s18  ;;  %s266_s23 = sshll.u32 %s259_s27, 4  ;;  %s1391_s23 = int_to_ptr.vmem [resolvable:$true] %s266_s23 }
  0x6a   : > { %s945_s0 = scalar_lea.hbm %s1388_s16, 256  ;;  %p1601_p1 = pneg %p1238_p7 }
  0x6b   : > { %p946_p5 = scmp.ne.s32.totalorder %s1388_s16, %s945_s0  ;;  %s950_s12 = scalar_lea.hbm %s1557_s3, 1024 }
  0x6c   : > { %p951_p9 = scmp.lt.u32.totalorder %s1388_s16, %s1557_s3  ;;  %p952_p2 = scmp.lt.u32.totalorder %s950_s12, %s945_s0 }
  0x6d   : > { %p948_p0 = pnand %p946_p5, %p1601_p1  ;;  %p954_p8 = scmp.lt.u32.totalorder %s945_s0, %s1388_s16 }
  0x6e   : > { %p953_p4 = por %p952_p2, %p951_p9 }
  0x6f   : > { %p949_p3 = pneg %p948_p0 }
  0x70   : > { %p955_p12 = por %p954_p8, %p953_p4 }
  0x72   : > { %p956_p13 = pnand %p955_p12, %p949_p3 }
  0x74   : > { %959 = shalt.err (!%p956_p13)
}
  0x75   : > { %s960_s4 = scalar_lea.vmem %s1391_s23, 256  ;;  %p1602_p6 = pmov %p1601_p1 }
  0x76   : > { %p961_p11 = scmp.ne.s32.totalorder %s1391_s23, %s960_s4  ;;  %s1110_s15 = smov [#allocation7]  }
  0x77   : > { %s965_s18 = sshll.u32 %s1110_s15, 4  ;;  %s966_s18 = int_to_ptr.vmem [resolvable:$false] %s965_s18 }
  0x78   : > { %p963_p10 = pnand %p961_p11, %p1602_p6  ;;  %s967_s13 = scalar_lea.vmem %s966_s18, 512 }
  0x79   : > { %p968_p1 = scmp.lt.s32.totalorder %s1391_s23, %s966_s18  ;;  %p969_p0 = scmp.lt.s32.totalorder %s967_s13, %s960_s4 }
  0x7a   : > { %p964_p5 = pneg %p963_p10 }
  0x7b   : > { %p970_p9 = por %p969_p0, %p968_p1 }
  0x7d   : > { %p971_p2 = pnand %p970_p9, %p964_p5 }
  0x7f   : > { %974 = shalt.err (!%p971_p2)
}
  0x80   : > { %s1603_s0 = smov 8   ;;  %s1604_s10 = smov 128  }
  0x81   : > { %770 = dma.hbm_to_vmem [thread:$0]  (!%p1238_p7), %s1388_s16, 256, %s1391_s23, %s1245_s6, %s1604_s10, %s1604_s10, %s1603_s0  }
  0x82   : > { %p1605_p3 = scmp.ne.s32.totalorder %s1587_s8, 0 }
  0x83   : > { %s1423_s27 = sand.u32 (!%p1605_p3), 1, %s1077_s22   ;;  %p1606_p4 = scmp.ne.s32.totalorder (!%p1605_p3), %s1591_s30, 0 }
  0x84   : > { %278 = sbr.rel (%p1605_p3) target bundleno = 782 (0x30e), region = 40  ;;  %s687_s9 = sshll.u32 (!%p1605_p3), %s1423_s27, 3 }
  0x85   : > { %s281_s1 = scalar_lea.sflag (!%p1605_p3), [#allocation3], %s1423_s27  ;;  %s1427_s12 = scalar_lea.vmem (!%p1605_p3), [#allocation2], %s687_s9 }
  0x8b   : > { %1048 = dma.done.wait (%p1606_p4), %s281_s1, 128  }
  0x8c   : > { %1050 = vsyncadd (%p1606_p4), %s281_s1, 4294967168  ;;  %s289_s7 = sand.u32 1, %s1283_s11   ;;  %s291_s6 = sand.u32 1, %s1065_s19  }
  0x8d   : > { %s688_s8 = sshll.u32 %s291_s6, 5  ;;  %s290_s16 = scalar_lea.sflag [#allocation6], %s289_s7 }
  0x8e   : > { %s1435_s23 = scalar_lea.vmem [#allocation5], %s688_s8  ;;  %p1607_p7 = scmp.ne.s32.totalorder %s1593_s17, 0 }
  0x90   : > { %1052 = dma.done.wait (%p1607_p7), %s290_s16, 768  }
  0x91   : > { %1054 = vsyncadd (%p1607_p7), %s290_s16, 4294966528  ;;  %s1441_s25 = sshll.u32 %s291_s6, 4  ;;  %s690_s30 = sshll.u32 %s1423_s27, 4 }
  0x92   : > { %p343_p8 = scmp.lt.s32.totalorder %s1085_s24, 3  ;;  %s302_s18 = scalar_lea.vmem [#allocation7], %s1441_s25 }
  0x93   : > { %s1453_s13 = scalar_lea.vmem [#allocation8], %s690_s30  ;;  %p691_p12 = scmp.ne.s32.totalorder %s1085_s24, 0 }
  0x94   : > { %s1446_s29 = scalar_select %p343_p8, %s1085_s24, 3 }
  0x95   : > { %352 = sbr.rel (%p691_p12) target bundleno = 156 (0x9c), region = 56  ;;  %v1111_v0 = vmov (!%p691_p12), 0.0  }
  0x96   : > { %s345_s15 = scalar_lea.vmem %s1556_s2, %s1446_s29  ;;  %353 = vst [vmem:[%s1453_s13] sm:$0xff] (!%p691_p12), %v1111_v0  ;;  %354 = vst [vmem:[%s1453_s13 + $0x8] sm:$0xff] (!%p691_p12), %v1111_v0 }
  0x9c PF: > { %v357_v1 = vld [vmem:[%s1435_s23] sm:$0xff]  ;;  %v1112_v2 = vmov 0.0   ;;  %vm1113_vm0 = vmmov 0   ;;  %v358_v5 = vld [vmem:[%s1435_s23 + $0x8] sm:$0xff]  ;;  %v359_v8 = vld [vmem:[%s1435_s23 + $0x10] sm:$0xff]  ;;  %s1114_s10 = smov 64  }
  0x9d   : > { %721 = vmatprep.subr.bf16.mxu0 %v1112_v2  ;;  %v361_v3 = vunpack.c.l.s8.bf16 %v357_v1  ;;  %737 = vmatprep.mubr.msk.bf16.mxu0 %vm1113_vm0, %v1112_v2  ;;  %v362_v4 = vunpack.c.h.s8.bf16 %v357_v1  ;;  %v363_v6 = vunpack.c.l.s8.bf16 %v358_v5  ;;  %v364_v7 = vunpack.c.h.s8.bf16 %v358_v5  ;;  %v360_v11 = vld [vmem:[%s1435_s23 + $0x18] sm:$0xff]  ;;  %v449_v15 = vld [vmem:[%s302_s18] sm:$0xff]  ;;  %p697_p13 = scmp.ne.s32.totalorder %s1085_s24, 3 }
  0x9e   : > { %741 = vmatprep.subr.bf16.mxu1 %v1112_v2  ;;  %749 = vmatprep.mubr.msk.bf16.mxu1 %vm1113_vm0, %v1112_v2  ;;  %v365_v9 = vunpack.c.l.s8.bf16 %v359_v8  ;;  %v366_v10 = vunpack.c.h.s8.bf16 %v359_v8  ;;  %v367_v12 = vunpack.c.l.s8.bf16 %v360_v11  ;;  %v368_v13 = vunpack.c.h.s8.bf16 %v360_v11  ;;  %v876_v14 = vld [vmem:[%s1427_s12] sm:$0xff]   ;;  %v455_v43 = vld [vmem:[%s1453_s13] sm:$0xff]  ;;  %s1608_s12 = sld [smem:[#allocation21_spill]] (!%p697_p13) }
  0x9f   : > { %722 = vmatpush3.bf16.msra.mxu0 %v361_v3  ;;  %v451_v16 = vunpack.c.l.s8.bf16 %v449_v15  ;;  %v452_v17 = vunpack.c.h.s8.bf16 %v449_v15  ;;  %v450_v18 = vld [vmem:[%s302_s18 + $0x8] sm:$0xff]  ;;  %v693_v21 = vld [vmem:[%s345_s15] ss:$0 sm:$0xff]  ;;  %vm458_vm1 = vcmask 523264  }
  0xa0   : > { %723 = vmatprep.subr.bf16.mxu0 %v1112_v2  ;;  %v453_v19 = vunpack.c.l.s8.bf16 %v450_v18  ;;  %v454_v20 = vunpack.c.h.s8.bf16 %v450_v18  ;;  %v456_v45 = vld [vmem:[%s1453_s13 + $0x8] sm:$0xff] }
  0xa1   : > { %742 = vmatpush3.bf16.msra.mxu1 %v451_v16 }
  0xa2   : > { %743 = vmatprep.subr.bf16.mxu1 %v1112_v2 }
  0xa3   : > { %724 = vmatpush3.bf16.msra.mxu0 %v362_v4 }
  0xa4   : > { %725 = vmatprep.subr.bf16.mxu0 %v1112_v2  ;;  %v698_v52 = vld [vmem:[%s1608_s12] ss:$0 sm:$0xff] (!%p697_p13) }
  0xa5   : > { %744 = vmatpush3.bf16.msra.mxu1 %v452_v17 }
  0xa6   : > { %745 = vmatprep.subr.bf16.mxu1 %v1112_v2 }
  0xa7   : > { %726 = vmatpush3.bf16.msra.mxu0 %v363_v6 }
  0xa8   : > { %727 = vmatprep.subr.bf16.mxu0 %v1112_v2 }
  0xa9   : > { %746 = vmatpush3.bf16.msra.mxu1 %v453_v19 }
  0xaa   : > { %747 = vmatprep.subr.bf16.mxu1 %v1112_v2 }
  0xab   : > { %728 = vmatpush3.bf16.msra.mxu0 %v364_v7 }
  0xac   : > { %729 = vmatprep.subr.bf16.mxu0 %v1112_v2 }
  0xad   : > { %748 = vmatpush3.bf16.msra.mxu1 %v454_v20 }
  0xaf   : > { %730 = vmatpush3.bf16.msra.mxu0 %v365_v9 }
  0xb0   : > { %731 = vmatprep.subr.bf16.mxu0 %v1112_v2 }
  0xb3   : > { %732 = vmatpush3.bf16.msra.mxu0 %v366_v10 }
  0xb4   : > { %733 = vmatprep.subr.bf16.mxu0 %v1112_v2 }
  0xb7   : > { %734 = vmatpush3.bf16.msra.mxu0 %v367_v12 }
  0xb8   : > { %735 = vmatprep.subr.bf16.mxu0 %v1112_v2 }
  0xbb   : > { %736 = vmatpush3.bf16.msra.mxu0 %v368_v13 }
  0xbe   : > { %738 = vmatmul.mubr.bf16.vlgmr.msra.gmra.mrb[0].mxu0 %v876_v14 }
 0x191   : > { %v409_v22 = vpop.f32.mrb[0].mxu0 }
 0x192   : > { %v423_v23 = vmul.f32 %v693_v21, %v409_v22  ;;  %v739_v24 = vpop.f32.mrb[1].mxu0 }
 0x193   : > { %v412_v25 = vpop.f32.mrb[2].mxu0 }
 0x194   : > { %441 = vrot.lane.b32.xlu0 %v423_v23, %s1114_s10  ;;  %v740_v26 = vpop.f32.mrb[3].mxu0  ;;  %v424_v27 = vmul.f32 %v693_v21, %v412_v25  ;;  %v694_v28 = vmul.f32 -1.442695, %v423_v23 }
 0x196   : > { %v695_v29 = vmul.f32 -1.442695, %v424_v27  ;;  %877 = vpow2.f32 %v694_v28 }
 0x198   : > { %443 = vrot.lane.b32.xlu0 %v424_v27, %s1114_s10  ;;  %879 = vpow2.f32 %v695_v29 }
 0x1a0   : > { %v878_v30 = vpop.eup %877 }
 0x1a1   : > { %v431_v32 = vadd.f32 1.0, %v878_v30 }
 0x1a2   : > { %v880_v31 = vpop.eup %879 }
 0x1a3   : > { %v432_v33 = vadd.f32 1.0, %v880_v31  ;;  %881 = vrcp.f32 %v431_v32 }
 0x1a5   : > { %883 = vrcp.f32 %v432_v33 }
 0x1ad   : > { %v882_v34 = vpop.eup %881 }
 0x1ae   : > { %v437_v37 = vmul.f32 %v882_v34, %v423_v23 }
 0x1af   : > { %v884_v35 = vpop.eup %883 }
 0x1b0   : > { %v438_v38 = vmul.f32 %v884_v35, %v424_v27 }
 0x206   : > { %v442_v36 = vpop.permute.xlu0 %441 }
 0x207   : > { %v447_v40 = vmul.f32 %v442_v36, %v437_v37 }
 0x20a   : > { %v444_v39 = vpop.permute.xlu0 %443 }
 0x20b   : > { %v448_v41 = vmul.f32 %v444_v39, %v438_v38 }
 0x20d   : > { %v457_v42 = vpack.c.bf16 %v448_v41, %v447_v40 }
 0x20f   : > { %750 = vmatmul.mubr.msk.bf16.vlgmr.msra.gmra.mrb[0].mxu1 %vm458_vm1, %v457_v42 }
 0x2e1   : > { %510 = sbr.rel (%p697_p13) target bundleno = 754 (0x2f2), region = 60 }
 0x2e2   : > { %v496_v44 = vpop.f32.mrb[0].mxu1 }
 0x2e3   : > { %v503_v46 = vadd.f32 %v496_v44, %v455_v43  ;;  %v751_v47 = vpop.f32.mrb[1].mxu1 }
 0x2e4   : > { %v499_v48 = vpop.f32.mrb[2].mxu1 }
 0x2e5   : > { %505 = vst [vmem:[%s1453_s13] sm:$0xff] %v503_v46  ;;  %v504_v49 = vadd.f32 %v499_v48, %v456_v45  ;;  %v752_v50 = vpop.f32.mrb[3].mxu1 }
 0x2e7   : > { %506 = vst [vmem:[%s1453_s13 + $0x8] sm:$0xff] %v504_v49 }
 0x2ec   : > { %v511_v51 = vld [vmem:[%s1453_s13] sm:$0xff] }
 0x2ed   : > { %v520_v54 = vmul.f32 %v698_v52, %v511_v51 }
 0x2ee   : > { %v512_v53 = vld [vmem:[%s1453_s13 + $0x8] sm:$0xff] }
 0x2ef   : > { %v521_v55 = vmul.f32 %v698_v52, %v512_v53  ;;  %522 = vst [vmem:[%s1453_s13] sm:$0xff] %v520_v54 }
 0x2f1   : > { %523 = vst [vmem:[%s1453_s13 + $0x8] sm:$0xff] %v521_v55 }
 0x2f2 PF: > { %s1609_s7 = sld [smem:[#allocation13_spill]]  ;;  %s1610_s16 = sld [smem:[#allocation22_spill]] }
 0x2f3   : > { %s538_s25 = sshll.u32 %s1453_s13, 4  ;;  %s525_s30 = scalar_lea.sflag [#allocation4], %s1423_s27  ;;  %s1491_s25 = int_to_ptr.vmem [resolvable:$true] %s538_s25 }
 0x2f4   : > { %s975_s29 = scalar_lea.vmem %s1491_s25, 256  ;;  %p1611_p6 = scmp.ne.s32.totalorder %s1594_s14, 0 }
 0x2f5   : > { %p976_p11 = scmp.ne.s32.totalorder %s1491_s25, %s975_s29  ;;  %s1115_s11 = smov [#allocation8]  }
 0x2f6   : > { %s979_s4 = sshll.u32 %s1115_s11, 4  ;;  %s980_s4 = int_to_ptr.vmem [resolvable:$false] %s979_s4 }
 0x2f7   : > { %p977_p10 = pnand %p976_p11, %p1611_p6  ;;  %s981_s15 = scalar_lea.vmem %s980_s4, 512 }
 0x2f8   : > { %s706_s24 = sshll.u32 %s1609_s7, 8  ;;  %p982_p1 = scmp.lt.s32.totalorder %s1491_s25, %s980_s4 }
 0x2f9   : > { %s1488_s23 = scalar_lea.hbm %s1610_s16, %s706_s24  ;;  %p978_p5 = pneg %p977_p10 }
 0x2fa   : > { %p983_p0 = scmp.lt.s32.totalorder %s981_s15, %s975_s29 }
 0x2fc   : > { %p984_p9 = por %p983_p0, %p982_p1 }
 0x2fe   : > { %p985_p2 = pnand %p984_p9, %p978_p5 }
 0x300   : > { %988 = shalt.err (!%p985_p2)
}
 0x301   : > { %s989_s18 = scalar_lea.hbm %s1488_s23, 256  ;;  %s993_s0 = scalar_lea.hbm %s1610_s16, 512 }
 0x302   : > { %p990_p3 = scmp.ne.s32.totalorder %s1488_s23, %s989_s18  ;;  %p994_p8 = scmp.lt.u32.totalorder %s1488_s23, %s1610_s16 }
 0x303   : > { %p995_p12 = scmp.lt.u32.totalorder %s993_s0, %s989_s18  ;;  %p997_p11 = scmp.lt.u32.totalorder %s989_s18, %s1488_s23 }
 0x304   : > { %p991_p4 = pnand %p990_p3, %p1611_p6 }
 0x305   : > { %p996_p13 = por %p995_p12, %p994_p8 }
 0x306   : > { %p992_p7 = pneg %p991_p4 }
 0x307   : > { %p998_p10 = por %p997_p11, %p996_p13 }
 0x309   : > { %p999_p5 = pnand %p998_p10, %p992_p7 }
 0x30b   : > { %1002 = shalt.err (!%p999_p5)
}
 0x30c   : > { %s1116_s1 = smov 128   ;;  %s1117_s12 = smov 8  }
 0x30d   : > { %759 = dma.vmem_to_hbm [thread:$0]  (%p1611_p6), %s1491_s25, 256, %s1488_s23, %s525_s30, %s1116_s1, %s1116_s1, %s1117_s12  }
 0x30e PF: > { %p776_p1 = scmp.ge.s32.totalorder %s1101_s28, 2  ;;  %s553_s7 = sand.u32 1, %s1073_s21  }
 0x30f   : > { %p1612_p0 = scmp.ne.s32.totalorder %s1596_s5, 0  ;;  %s554_s24 = scalar_lea.sflag [#allocation4], %s553_s7 }
 0x311   : > { %p772_p9 = pnand %p776_p1, %p1612_p0 }
 0x313   : > { %1056 = dma.done.wait (!%p772_p9), %s554_s24, 256  }
 0x314   : > { %1058 = vsyncadd (!%p772_p9), %s554_s24, 4294967040  ;;  %s24_s28 = sadd.s32 1, %s1101_s28   ;;  %s1613_s6 = sld [smem:[#allocation16_spill]] }
 0x315   : > { %p21_p2 = scmp.ge.s32.totalorder %s24_s28, 10   ;;  %s1614_s14 = sld [smem:[#allocation12_spill]] }
 0x316   : > { %s1615_s23 = sld [smem:[#allocation18_spill]]  ;;  %s1616_s25 = sld [smem:[#allocation14_spill]] }
 0x317   : > { %s1617_s27 = sld [smem:[#allocation15_spill]]  ;;  %s1618_s8 = sld [smem:[#allocation17_spill]] }
 0x318   : > { %s1619_s18 = smov %s1065_s19  ;;  %s1620_s19 = smov %s1069_s20 }
 0x319   : > { %s1622_s21 = smov %s1077_s22  ;;  %s1624_s24 = smov %s1093_s26 }
 0x31a   : > { %s1621_s20 = smov %s1613_s6  ;;  %23 = sbr.rel (!%p21_p2) target bundleno = 16 (0x10), region = 120 }
 0x31b   : > { %s1623_s22 = smov %s1614_s14 }
 0x31d   : > { %s1625_s26 = smov %s1617_s27  ;;  %s1626_s27 = smov %s1618_s8 }
 0x321   :  { %559 = vsyncpa [#allocation3], 1 }
 0x322   :  { %561 = vsyncpa [#allocation3 + $0x1], 1 }
 0x323   :  { %562 = vsyncpa [#allocation6], 1 }
 0x324   :  { %564 = vsyncpa [#allocation6 + $0x1], 1 }
 0x325   :  { %565 = vsyncpa [#allocation4], 1 }
 0x326   :  { %567 = vsyncpa [#allocation4 + $0x1], 1 }

</bundles_post_ra>
